<compile_context>
chip_gen: v7x
topology: tpu7x:2x2x1
jax: 0.10.0
libtpu: 0.0.40
codegen_flags: <defaults>
</compile_context>

<pallas_src>
import jax
import jax.numpy as jnp
from jax.experimental import pallas as pl
from jax.experimental.pallas import tpu as pltpu

_LANE = 128
_COL_CANDIDATES = (2048, 1024, 512, 256, 128)


def _sublane_multiple(dtype) -> int:
    # packed-sublane minimum per dtype width: f32 -> 8, bf16 -> 16, 8-bit -> 32
    return {4: 8, 2: 16, 1: 32}.get(jnp.dtype(dtype).itemsize, 8)


def _default_block_bytes() -> int:
    # ~2 MiB blocks on v5e-and-older (16 MiB default scoped VMEM),
    # ~4 MiB on v6e/v7x (32 MiB default scoped VMEM).
    try:
        kind = jax.devices()[0].device_kind.lower()
    except Exception:
        kind = ""
    if any(tag in kind for tag in ("v2", "v3", "v4", "v5")):
        return 2 * 1024 * 1024
    return 4 * 1024 * 1024


def _sine_kernel(x_ref, o_ref):
    x = x_ref[...]
    if x.dtype == jnp.float32:
        o_ref[...] = jnp.sin(x)
    else:
        # f32 compute (required on v5e, cheap everywhere), cast back on store.
        # NOTE: torch.sin on bf16 computes in bf16; a few-ULP difference is
        # expected and acceptable.
        o_ref[...] = jnp.sin(x.astype(jnp.float32)).astype(o_ref.dtype)


def sine(x: jax.Array, *, target_block_bytes: int | None = None,
         min_pallas_bytes: int = 256 * 1024) -> jax.Array:
    """Computes sin(x) with a Pallas TPU kernel. Matches torch.sin(x)."""
    dtype = x.dtype
    n = x.size
    itemsize = jnp.dtype(dtype).itemsize

    # Small-input bypass: launch overhead dominates; XLA's fused sin is as
    # fast and fuses with neighboring ops.
    if n == 0 or n * itemsize < min_pallas_bytes:
        return jnp.sin(x)

    sub = _sublane_multiple(dtype)

    # ---- lane-dense 2D view (rows, cols): prefer cols that leaves rows
    # sublane-aligned (full vregs, unmasked stores); else any 128-mult divisor.
    cols = None
    for cand in _COL_CANDIDATES:
        if n % cand == 0 and (n // cand) % sub == 0:
            cols = cand
            break
    if cols is None:
        for cand in _COL_CANDIDATES:
            if n % cand == 0:
                cols = cand
                break
    if cols is None:
        # Ragged size (not a multiple of 128): plain jnp.sin is already
        # bandwidth-optimal and avoids any pad/unpad HBM passes.
        return jnp.sin(x)

    rows = n // cols
    x2d = jnp.ravel(x).reshape(rows, cols)  # free view on contiguous data

    if target_block_bytes is None:
        target_block_bytes = _default_block_bytes()

    # ---- sublane-aligned block rows targeting ~target_block_bytes payload,
    # with >= 2 grid steps whenever rows > sub (keeps both v7x TCs streaming).
    max_block_rows = max(sub, (target_block_bytes // (cols * itemsize)) // sub * sub)
    if rows <= sub:
        block_rows = rows  # equals the full dim -> always a legal block shape
    else:
        half = (rows + 1) // 2
        half_aligned = ((half + sub - 1) // sub) * sub  # <= rows when rows > sub
        block_rows = min(max_block_rows, half_aligned)

    grid = (pl.cdiv(rows, block_rows),)  # partial last block is masked by Pallas

    cost = pl.CostEstimate(
        flops=0,
        transcendentals=n,
        bytes_accessed=2 * n * itemsize,
    )

    out2d = pl.pallas_call(
        _sine_kernel,
        out_shape=jax.ShapeDtypeStruct((rows, cols), dtype),
        grid_spec=pl.GridSpec(
            grid=grid,
            in_specs=[pl.BlockSpec((block_rows, cols), lambda i: (i, 0))],
            out_specs=pl.BlockSpec((block_rows, cols), lambda i: (i, 0)),
        ),
        compiler_params=pltpu.CompilerParams(
            dimension_semantics=("parallel",),  # megacore sharding on v7x
        ),
        cost_estimate=cost,
    )(x2d)

    return out2d.reshape(x.shape)  # exact size -> free view, no slice pass


if __name__ == "__main__":
    key = jax.random.PRNGKey(0)

    # Small NCHW input consistent with the module (2*4*16*16 = 2048 elements).
    # Force the Pallas path (default small-input bypass would use jnp.sin).
    x = jax.random.normal(key, (2, 4, 16, 16), dtype=jnp.float32)
    y = sine(x, min_pallas_bytes=0)
    jax.block_until_ready(y)
    assert y.shape == x.shape and y.dtype == x.dtype
    assert jnp.allclose(y, jnp.sin(x), atol=1e-6, rtol=1e-6)

    # Larger aligned input: goes through the Pallas path by default and
    # exercises the multi-step (megacore-friendly) grid.
    x2 = jax.random.normal(jax.random.PRNGKey(1), (8, 256, 128), dtype=jnp.float32)
    y2 = sine(x2)
    jax.block_until_ready(y2)
    assert jnp.allclose(y2, jnp.sin(x2), atol=1e-6, rtol=1e-6)

    # Ragged size (not a multiple of 128): plain-jnp fallback, no pad passes.
    x3 = jax.random.normal(jax.random.PRNGKey(2), (3, 5, 7), dtype=jnp.float32)
    y3 = sine(x3)
    jax.block_until_ready(y3)
    assert y3.shape == x3.shape and y3.dtype == x3.dtype
    assert jnp.allclose(y3, jnp.sin(x3), atol=1e-6, rtol=1e-6)

    # bf16 input: f32 compute inside the kernel, bf16 store.
    x4 = jax.random.normal(jax.random.PRNGKey(3), (4, 64, 128), dtype=jnp.bfloat16)
    y4 = sine(x4, min_pallas_bytes=0)
    jax.block_until_ready(y4)
    assert y4.shape == x4.shape and y4.dtype == jnp.bfloat16
    assert jnp.allclose(y4.astype(jnp.float32),
                        jnp.sin(x4.astype(jnp.float32)), atol=2e-2, rtol=2e-2)

    print("KERNEL_OK")
</pallas_src>

<mosaic_0001>
module attributes {stable_mosaic.version = 11 : i64} {
  func.func @_sine_kernel(%arg0: i32, %arg1: memref<8x256xf32, #tpu.memory_space<vmem>>, %arg2: memref<8x256xf32, #tpu.memory_space<vmem>>) attributes {dimension_semantics = [#tpu.dimension_semantics<parallel>], iteration_bounds = array<i64: 1>, scalar_prefetch = 0 : i64, scratch_operands = 0 : i64, tpu.core_type = #tpu.core_type<tc>, window_params = [{transform_indices = @transform_0, window_bounds = array<i64: 8, 256>}, {transform_indices = @transform_1, window_bounds = array<i64: 8, 256>}]} {
    %c0 = arith.constant 0 : index
    %c0_0 = arith.constant 0 : index
    %0 = vector.load %arg1[%c0, %c0_0] : memref<8x256xf32, #tpu.memory_space<vmem>>, vector<8x256xf32>
    %1 = math.sin %0 : vector<8x256xf32>
    %c0_1 = arith.constant 0 : index
    %c0_2 = arith.constant 0 : index
    %2 = vector.load %arg2[%c0_1, %c0_2] : memref<8x256xf32, #tpu.memory_space<vmem>>, vector<8x256xf32>
    tpu.vector_store %arg2[%c0_1, %c0_2], %1 {strides = array<i32>} : memref<8x256xf32, #tpu.memory_space<vmem>>, vector<8x256xf32>,
    return
  }
  func.func @transform_0(%arg0: i32) -> (i32, i32) {
    %c0_i32 = arith.constant 0 : i32
    %c0_i32_0 = arith.constant 0 : i32
    return %arg0, %c0_i32 : i32, i32
  }
  func.func @transform_1(%arg0: i32) -> (i32, i32) {
    %c0_i32 = arith.constant 0 : i32
    %c0_i32_0 = arith.constant 0 : i32
    return %arg0, %c0_i32 : i32, i32
  }
}

</mosaic_0001>

<bundles_post_ra>
// kernel: tpu_custom_call.1
= control target key start
LH: loop header
LB: loop body
LE: loop exit
PB: predicated region body
PF: predicated region fallthrough
CT: control target
= control target key end

     0   :  { %6 = vsyncpa [#allocation3], 0  ;;  %s440_s0 = inlined_call_operand.hbm [shape: f32[8,256], index: 0, kind: input, shape index: {}]   ;;  %s441_s1 = inlined_call_operand.hbm [shape: f32[8,256], index: 1, kind: output, shape index: {}]  }
   0x1   :  { %7 = vsyncpa [#allocation4], 0  ;;  %s328_s6 = smov [#allocation2]   ;;  %s280_s10 = scalar_lea.hbm %s440_s0, 256 }
   0x2   :  { %s14_s7 = sshll.u32 %s328_s6, 4  ;;  %p281_p0 = scmp.ne.s32.totalorder %s440_s0, %s280_s10  ;;  %s15_s7 = int_to_ptr.vmem [resolvable:$true] %s14_s7 }
   0x3   :  { %p284_p1 = scmp.lt.u32.totalorder %s280_s10, %s440_s0 }
   0x5   :  { %p286_p2 = pnand %p284_p1, %p281_p0 }
   0x7   :  { %289 = shalt.err (!%p286_p2)
}
   0x8   :  { %s290_s15 = scalar_lea.vmem %s15_s7, 256  ;;  %p295_p4 = scmp.lt.s32.totalorder %s15_s7, %s15_s7 }
   0x9   :  { %p291_p3 = scmp.ne.s32.totalorder %s15_s7, %s290_s15  ;;  %p296_p5 = scmp.lt.s32.totalorder %s290_s15, %s290_s15 }
   0xb   :  { %p297_p6 = por %p296_p5, %p295_p4 }
   0xd   :  { %p298_p7 = pnand %p297_p6, %p291_p3 }
   0xf   :  { %301 = shalt.err (!%p298_p7)
}
  0x10   :  { %17 = dma.hbm_to_vmem [thread:$0]  %s440_s0, 256, %s15_s7, [#allocation3]  }
  0x11   :  { %324 = dma.done.wait [#allocation3], 256  }
  0x12   :  { %325 = vsyncadd [#allocation3], 4294967040  ;;  %v358_v0 = vld [vmem:[#allocation2] sm:$0xff]  ;;  %v360_v1 = vld [vmem:[#allocation2 + $0x8] sm:$0xff]  ;;  %v329_v24 = vmov 683565275  }
  0x13   :  { %v23_v2 = vand.u32 2147483647, %v358_v0  ;;  %v26_v3 = vand.u32 2139095040, %v358_v0  ;;  %v127_v4 = vand.u32 2147483647, %v360_v1  ;;  %v130_v5 = vand.u32 2139095040, %v360_v1 }
  0x14   :  { %v330_v26 = vmov 2475754826   ;;  %v331_v28 = vmov 2131351028   ;;  %v332_v30 = vmov 2102212464  }
  0x15   :  { %v27_v6 = vshrl.u32 %v26_v3, 23  ;;  %v30_v7 = vand.u32 8388607, %v23_v2  ;;  %v131_v8 = vshrl.u32 %v130_v5, 23  ;;  %v134_v9 = vand.u32 8388607, %v127_v4 }
  0x16   :  { %v333_v32 = vmov 920167782   ;;  %v334_v40 = vmov 1326507024   ;;  %vm25_vm14 = vcmp.lt.s32.totalorder %v358_v0, 0  ;;  %s335_s0 = smov [#allocation5]  }
  0x17   :  { %v248_v10 = vadd.s32 4294967169, %v27_v6  ;;  %v252_v11 = vadd.s32 4294967169, %v131_v8  ;;  %v31_v13 = vor.u32 8388608, %v30_v7  ;;  %v135_v14 = vor.u32 8388608, %v134_v9  ;;  %s239_s18 = sshll.u32 %s335_s0, 4  ;;  %s240_s18 = int_to_ptr.vmem [resolvable:$true] %s239_s18 }
  0x18   :  { %vm24_vm15 = vcmp.le.f32.partialorder %v23_v2, 0.7853982  ;;  %s302_s19 = scalar_lea.vmem %s240_s18, 256  ;;  %p307_p9 = scmp.lt.s32.totalorder %s240_s18, %s240_s18 }
  0x19   :  { %v33_v12 = vadd.s32 1, %v248_v10  ;;  %v137_v15 = vadd.s32 1, %v252_v11  ;;  %v370_v20 = vshll.u32 %v31_v13, 8  ;;  %v372_v22 = vshll.u32 %v135_v14, 8  ;;  %p303_p8 = scmp.ne.s32.totalorder %s240_s18, %s302_s19  ;;  %p308_p10 = scmp.lt.s32.totalorder %s302_s19, %s302_s19 }
  0x1b   :  { %vm34_vm0 = vcmp.gt.s32.totalorder %v33_v12, 0  ;;  %vm138_vm1 = vcmp.gt.s32.totalorder %v137_v15, 0  ;;  %p309_p11 = por %p308_p10, %p307_p9 }
  0x1c   :  { %v35_v16 = vsel %vm34_vm0, %v33_v12, 0  ;;  %v139_v19 = vsel %vm138_vm1, %v137_v15, 0  ;;  %vm129_vm0 = vcmp.lt.s32.totalorder %v360_v1, 0  ;;  %vm128_vm1 = vcmp.le.f32.partialorder %v127_v4, 0.7853982 }
  0x1d   :  { %v36_v17 = vshrl.u32 %v35_v16, 5  ;;  %v37_v18 = vand.u32 31, %v35_v16  ;;  %v141_v21 = vand.u32 31, %v139_v19  ;;  %v374_v34 = vshrl.u32 %v139_v19, 5  ;;  %p310_p12 = pnand %p309_p11, %p303_p8 }
  0x1f   :  { %v38_v23 = vsub.s32 32, %v37_v18  ;;  %v40_v25 = vshll.u32 %v329_v24, %v37_v18  ;;  %v43_v27 = vshll.u32 %v330_v26, %v37_v18  ;;  %v46_v29 = vshll.u32 %v331_v28, %v37_v18 }
  0x20   :  { %v49_v31 = vshll.u32 %v332_v30, %v37_v18  ;;  %v52_v33 = vshll.u32 %v333_v32, %v37_v18  ;;  %vm55_vm2 = vcmp.lt.s32.totalorder %v36_v17, 1  ;;  %vm56_vm3 = vcmp.lt.s32.totalorder %v36_v17, 2 }
  0x21   :  { %v39_v35 = vshrl.u32 %v329_v24, %v38_v23  ;;  %v41_v36 = vshrl.u32 %v330_v26, %v38_v23  ;;  %v44_v37 = vshrl.u32 %v331_v28, %v38_v23  ;;  %v47_v38 = vshrl.u32 %v332_v30, %v38_v23 }
  0x22   :  { %v50_v39 = vshrl.u32 %v333_v32, %v38_v23  ;;  %v53_v41 = vshrl.u32 %v334_v40, %v38_v23  ;;  %vm58_vm4 = vcmp.lt.s32.totalorder %v36_v17, 4  ;;  %v142_v45 = vsub.s32 32, %v141_v21 }
  0x23   :  { %v42_v42 = vor.u32 %v41_v36, %v40_v25  ;;  %v45_v43 = vor.u32 %v44_v37, %v43_v27  ;;  %v48_v44 = vor.u32 %v47_v38, %v46_v29  ;;  %vm57_vm5 = vcmp.lt.s32.totalorder %v36_v17, 3 }
  0x24   :  { %v51_v46 = vor.u32 %v50_v39, %v49_v31  ;;  %v54_v47 = vor.u32 %v53_v41, %v52_v33  ;;  %v144_v48 = vshll.u32 %v329_v24, %v141_v21  ;;  %v147_v56 = vshll.u32 %v330_v26, %v141_v21 }
  0x25   :  { %v59_v49 = vsel %vm55_vm2, %v39_v35, %v42_v42  ;;  %v60_v50 = vsel %vm58_vm4, %v48_v44, 2102212464  ;;  %v63_v51 = vsel %vm55_vm2, %v42_v42, %v45_v43  ;;  %v67_v52 = vsel %vm55_vm2, %v45_v43, %v48_v44 }
  0x26   :  { %v61_v53 = vsel %vm57_vm5, %v45_v43, %v60_v50  ;;  %v64_v54 = vsel %vm58_vm4, %v51_v46, 920167782  ;;  %v68_v55 = vsel %vm58_vm4, %v54_v47, 1326507024  ;;  %v143_v59 = vshrl.u32 %v329_v24, %v142_v45 }
  0x27   :  { %v65_v57 = vsel %vm57_vm5, %v48_v44, %v64_v54  ;;  %v69_v58 = vsel %vm57_vm5, %v51_v46, %v68_v55  ;;  %v145_v60 = vshrl.u32 %v330_v26, %v142_v45  ;;  %v62_v61 = vsel %vm56_vm3, %v59_v49, %v61_v53 }
  0x28   :  { %v66_v62 = vsel %vm56_vm3, %v63_v51, %v65_v57  ;;  %v70_v63 = vsel %vm56_vm3, %v67_v52, %v69_v58  ;;  %v148_v3 = vshrl.u32 %v331_v28, %v142_v45  ;;  %v150_v11 = vshll.u32 %v331_v28, %v141_v21 }
  0x29   :  { %v383_v5 = vmul.u32.u64.low %v370_v20, %v70_v63  ;;  %v384_v6 = vmul.u32.u64.high %v370_v20, %v70_v63, %v383_v5  ;;  %v387_v7 = vmul.u32.u64.low %v370_v20, %v66_v62  ;;  %v388_v8 = vmul.u32.u64.high %v370_v20, %v66_v62, %v387_v7 }
  0x2a   :  { %v146_v9 = vor.u32 %v145_v60, %v144_v48  ;;  %v149_v10 = vor.u32 %v148_v3, %v147_v56  ;;  %v151_v12 = vshrl.u32 %v332_v30, %v142_v45  ;;  %v153_v13 = vshll.u32 %v332_v30, %v141_v21 }
  0x2b   :  { %v154_v14 = vshrl.u32 %v333_v32, %v142_v45  ;;  %v156_v15 = vshll.u32 %v333_v32, %v141_v21  ;;  %v157_v16 = vshrl.u32 %v334_v40, %v142_v45  ;;  %v78_v17 = vmul.u32 %v370_v20, %v62_v61 }
  0x2c   :  { %v152_v18 = vor.u32 %v151_v12, %v150_v11  ;;  %vm159_vm6 = vcmp.lt.s32.totalorder %v374_v34, 1  ;;  %vm160_vm7 = vcmp.lt.s32.totalorder %v374_v34, 2  ;;  %vm80_vm8 = vc.u32 %v384_v6, %v387_v7 }
  0x2d   :  { %v81_v19 = vadd.s32 1, %v388_v8  ;;  %v155_v23 = vor.u32 %v154_v14, %v153_v13  ;;  %vm161_vm9 = vcmp.lt.s32.totalorder %v374_v34, 3  ;;  %v158_v24 = vor.u32 %v157_v16, %v156_v15 }
  0x2e   :  { %vm162_vm10 = vcmp.lt.s32.totalorder %v374_v34, 4  ;;  %v163_v25 = vsel %vm159_vm6, %v143_v59, %v146_v9  ;;  %v167_v21 = vsel %vm159_vm6, %v146_v9, %v149_v10  ;;  %v171_v28 = vsel %vm159_vm6, %v149_v10, %v152_v18 }
  0x2f   :  { %v82_v26 = vsel %vm80_vm8, %v81_v19, %v388_v8  ;;  %v164_v20 = vsel %vm162_vm10, %v152_v18, 2102212464  ;;  %v168_v27 = vsel %vm162_vm10, %v155_v23, 920167782  ;;  %v172_v32 = vsel %vm162_vm10, %v158_v24, 1326507024 }
  0x30   :  { %v83_v29 = vadd.s32 %v82_v26, %v78_v17  ;;  %v165_v30 = vsel %vm161_vm9, %v149_v10, %v164_v20  ;;  %v169_v31 = vsel %vm161_vm9, %v152_v18, %v168_v27  ;;  %v173_v36 = vsel %vm161_vm9, %v155_v23, %v172_v32 }
  0x31   :  { %v166_v33 = vsel %vm160_vm7, %v163_v25, %v165_v30  ;;  %v170_v35 = vsel %vm160_vm7, %v167_v21, %v169_v31  ;;  %v174_v38 = vsel %vm160_vm7, %v171_v28, %v173_v36  ;;  %v79_v57 = vadd.s32 %v387_v7, %v384_v6 }
  0x32   :  { %v84_v37 = vadd.s32 536870912, %v83_v29  ;;  %v405_v39 = vmul.u32.u64.low %v372_v22, %v170_v35  ;;  %v406_v40 = vmul.u32.u64.high %v372_v22, %v170_v35, %v405_v39  ;;  %v182_v44 = vmul.u32 %v372_v22, %v166_v33 }
  0x33   :  { %v409_v41 = vmul.u32.u64.low %v372_v22, %v174_v38  ;;  %v410_v42 = vmul.u32.u64.high %v372_v22, %v174_v38, %v409_v41  ;;  %vm115_vm5 = vweird.f32 %v358_v0  ;;  %vm219_vm9 = vweird.f32 %v360_v1 }
  0x34   :  { %v85_v43 = vshrl.u32 %v84_v37, 30  ;;  %v185_v46 = vadd.s32 1, %v406_v40 }
  0x35   :  { %vm184_vm11 = vc.u32 %v410_v42, %v405_v39  ;;  %v183_v13 = vadd.s32 %v405_v39, %v410_v42 }
  0x36   :  { %v86_v45 = vshll.u32 %v85_v43, 30  ;;  %v186_v34 = vsel %vm184_vm11, %v185_v46, %v406_v40  ;;  %v109_v6 = vsub.s32 4, %v85_v43 }
  0x37   :  { %v187_v48 = vadd.s32 %v186_v34, %v182_v44 }
  0x38   :  { %v87_v47 = vsub.s32 %v83_v29, %v86_v45  ;;  %v110_v25 = vsel %vm25_vm14, %v109_v6, %v85_v43 }
  0x39   :  { %v188_v50 = vadd.s32 536870912, %v187_v48  ;;  %v112_v28 = vsel %vm24_vm15, 0, %v110_v25 }
  0x3a   :  { %v89_v49 = vsub.s32 0, %v87_v47  ;;  %v116_v33 = vadd.s32 3, %v112_v28 }
  0x3b   :  { %v189_v52 = vshrl.u32 %v188_v50, 30 }
  0x3c   :  { %v249_v51 = vmin.u32 %v89_v49, %v87_v47  ;;  %v117_v37 = vand.u32 3, %v116_v33 }
  0x3d   :  { %v190_v54 = vshll.u32 %v189_v52, 30  ;;  %v213_v32 = vsub.s32 4, %v189_v52 }
  0x3e   :  { %v91_v53 = vclz %v249_v51  ;;  %vm122_vm2 = vcmp.eq.s32.totalorder %v117_v37, 2  ;;  %vm119_vm3 = vcmp.eq.s32.totalorder %v117_v37, 0  ;;  %vm118_vm4 = vcmp.lt.s32.totalorder %v117_v37, 2 }
  0x3f   :  { %v191_v56 = vsub.s32 %v187_v48, %v190_v54  ;;  %v214_v36 = vsel %vm129_vm0, %v213_v32, %v189_v52 }
  0x40   :  { %v250_v55 = vadd.s32 4294967294, %v91_v53  ;;  %v216_v40 = vsel %vm128_vm1, 0, %v214_v36 }
  0x41   :  { %v193_v58 = vsub.s32 0, %v191_v56  ;;  %v220_v44 = vadd.s32 3, %v216_v40 }
  0x42   :  { %vm251_vm12 = vcmp.lt.s32.totalorder %v250_v55, 0 }
  0x43   :  { %v94_v22 = vsel %vm251_vm12, 0, %v250_v55  ;;  %v253_v62 = vmin.u32 %v193_v58, %v191_v56  ;;  %v221_v34 = vand.u32 3, %v220_v44 }
  0x44   :  { %v95_v59 = vsub.s32 32, %v94_v22  ;;  %v96_v60 = vshll.u32 %v87_v47, %v94_v22  ;;  %v99_v61 = vsub.s32 4294967266, %v94_v22 }
  0x45   :  { %v195_v5 = vclz %v253_v62  ;;  %vm226_vm6 = vcmp.eq.s32.totalorder %v221_v34, 2  ;;  %vm223_vm7 = vcmp.eq.s32.totalorder %v221_v34, 0  ;;  %vm222_vm8 = vcmp.lt.s32.totalorder %v221_v34, 2 }
  0x46   :  { %v97_v63 = vshrl.u32 %v79_v57, %v95_v59  ;;  %v100_v3 = vadd.s32 127, %v99_v61 }
  0x47   :  { %v254_v10 = vadd.s32 4294967294, %v195_v5 }
  0x48   :  { %v98_v8 = vor.u32 %v97_v63, %v96_v60  ;;  %v101_v9 = vshll.u32 %v100_v3, 23 }
  0x49   :  { %vm255_vm13 = vcmp.lt.s32.totalorder %v254_v10, 0 }
  0x4a   :  { %v102_v11 = vor.u32 4788187, %v101_v9  ;;  %v105_v12 = vcvt.s32.f32 %v98_v8  ;;  %v198_v7 = vsel %vm255_vm13, 0, %v254_v10 }
  0x4b   :  { %v199_v15 = vsub.s32 32, %v198_v7  ;;  %v200_v16 = vshll.u32 %v191_v56, %v198_v7  ;;  %v203_v17 = vsub.s32 4294967266, %v198_v7 }
  0x4c   :  { %v103_v14 = vand.u32 2147483647, %v102_v11 }
  0x4d   :  { %v201_v19 = vshrl.u32 %v183_v13, %v199_v15  ;;  %v204_v23 = vadd.s32 127, %v203_v17 }
  0x4e   :  { %v106_v18 = vmul.f32 %v105_v12, %v103_v14 }
  0x4f   :  { %v202_v21 = vor.u32 %v201_v19, %v200_v16  ;;  %v205_v26 = vshll.u32 %v204_v23, 23 }
  0x50   :  { %v107_v24 = vxor.u32 2147483648, %v106_v18 }
  0x51   :  { %v206_v29 = vor.u32 4788187, %v205_v26  ;;  %v209_v30 = vcvt.s32.f32 %v202_v21 }
  0x52   :  { %v108_v20 = vsel %vm25_vm14, %v107_v24, %v106_v18 }
  0x53   :  { %v111_v27 = vsel %vm24_vm15, %v358_v0, %v108_v20  ;;  %v207_v31 = vand.u32 2147483647, %v206_v29 }
  0x54   :  { %272 = vcosq.f32 %v111_v27 }
  0x55   :  { %274 = vsinq.f32 %v111_v27  ;;  %v210_v35 = vmul.f32 %v209_v30, %v207_v31 }
  0x57   :  { %v211_v2 = vxor.u32 2147483648, %v210_v35 }
  0x59   :  { %v212_v38 = vsel %vm129_vm0, %v211_v2, %v210_v35 }
  0x5a   :  { %v215_v39 = vsel %vm128_vm1, %v360_v1, %v212_v38 }
  0x5b   :  { %276 = vcosq.f32 %v215_v39 }
  0x5c   :  { %278 = vsinq.f32 %v215_v39 }
  0x5e   :  { %v273_v41 = vpop.eup %272 }
  0x5f   :  { %v275_v42 = vpop.eup %274  ;;  %v123_v43 = vxor.u32 2147483648, %v273_v41 }
  0x60   :  { %v120_v45 = vxor.u32 2147483648, %v275_v42 }
  0x61   :  { %v124_v4 = vsel %vm122_vm2, %v123_v43, %v275_v42 }
  0x62   :  { %v121_v46 = vsel %vm119_vm3, %v273_v41, %v120_v45 }
  0x63   :  { %v125_v47 = vsel %vm118_vm4, %v121_v46, %v124_v4 }
  0x64   :  { %v126_v48 = vsel %vm115_vm5, nan, %v125_v47 }
  0x65   :  { %231 = vst [vmem:[#allocation5] sm:$0xff] %v126_v48  ;;  %v277_v49 = vpop.eup %276 }
  0x66   :  { %v279_v50 = vpop.eup %278  ;;  %v227_v51 = vxor.u32 2147483648, %v277_v49 }
  0x67   :  { %v224_v52 = vxor.u32 2147483648, %v279_v50 }
  0x68   :  { %v228_v53 = vsel %vm226_vm6, %v227_v51, %v279_v50 }
  0x69   :  { %v225_v54 = vsel %vm223_vm7, %v277_v49, %v224_v52 }
  0x6a   :  { %v229_v0 = vsel %vm222_vm8, %v225_v54, %v228_v53 }
  0x6b   :  { %v230_v55 = vsel %vm219_vm9, nan, %v229_v0 }
  0x6c   :  { %232 = vst [vmem:[#allocation5 + $0x8] sm:$0xff] %v230_v55 }
  0x6d   :  { %313 = shalt.err (!%p310_p12)
}
  0x6e   :  { %s314_s22 = scalar_lea.hbm %s441_s1, 256 }
  0x6f   :  { %p315_p13 = scmp.ne.s32.totalorder %s441_s1, %s314_s22  ;;  %p318_p0 = scmp.lt.u32.totalorder %s314_s22, %s441_s1 }
  0x71   :  { %p320_p1 = pnand %p318_p0, %p315_p13 }
  0x73   :  { %323 = shalt.err (!%p320_p1)
}
  0x74   :  { %242 = dma.vmem_to_hbm [thread:$0]  %s240_s18, 256, %s441_s1, [#allocation4]  }
  0x75   :  { %326 = dma.done.wait [#allocation4], 256  }
  0x76   :  { %327 = vsyncadd [#allocation4], 4294967040 }
  0x77   :  { %246 = vsyncpa [#allocation3], 1 }
  0x78   :  { %247 = vsyncpa [#allocation4], 1 }

</bundles_post_ra>
